<compile_context>
chip_gen: v7x
topology: tpu7x:2x2x1
jax: 0.10.0
libtpu: 0.0.40
codegen_flags: <defaults>
</compile_context>

<pallas_src>
import numpy as np
import jax
import jax.numpy as jnp
from jax.experimental import pallas as pl
from jax.experimental.pallas import tpu as pltpu


# ----------------------------------------------------------------------------
# Diffusion schedule (matches get_named_beta_schedule('linear', 1000); the
# SpacedDiffusion(space_timesteps(1000, [1000])) keeps all 1000 steps, so
# alphas_cumprod is unchanged).
# ----------------------------------------------------------------------------
def make_diffusion_schedule(num_timesteps=1000):
    scale = 1000.0 / num_timesteps
    beta_start = scale * 0.0001
    beta_end = scale * 0.02
    betas = np.linspace(beta_start, beta_end, num_timesteps, dtype=np.float64)
    alphas = 1.0 - betas
    alphas_cumprod = np.cumprod(alphas, axis=0)
    sqrt_alphas_cumprod = np.sqrt(alphas_cumprod).astype(np.float32)
    sqrt_one_minus_alphas_cumprod = np.sqrt(1.0 - alphas_cumprod).astype(np.float32)
    return jnp.asarray(sqrt_alphas_cumprod), jnp.asarray(sqrt_one_minus_alphas_cumprod)


# ----------------------------------------------------------------------------
# Pallas kernel: x_t = a[b] * x + s[b] * noise  (per-batch scalar coefficients)
# ----------------------------------------------------------------------------
def _q_sample_kernel(coef_a_ref, coef_s_ref, x_ref, noise_ref, xt_ref):
    b = pl.program_id(0)
    a = coef_a_ref[b]           # scalar read from SMEM
    s = coef_s_ref[b]
    xt_ref[...] = (a * x_ref[...].astype(jnp.float32)
                   + s * noise_ref[...].astype(jnp.float32)).astype(xt_ref.dtype)


# ----------------------------------------------------------------------------
# Wrapper
# ----------------------------------------------------------------------------
def _to_lane_view(arr, B, flat, flat_pad, m_pad):
    a2 = arr.reshape(B, flat)
    if flat_pad != flat:
        a2 = jnp.pad(a2, ((0, 0), (0, flat_pad - flat)))
    return a2.reshape(B, m_pad, 128)


def q_sample_pallas(x, noise, coef_a, coef_s, *, tm_target=1024):
    """x, noise: (B, C, D, H, W).  coef_a/coef_s: (B,) float32.

    Returns x_t shaped like x, computed as coef_a[b]*x + coef_s[b]*noise.
    """
    orig_shape = x.shape
    B = x.shape[0]
    flat = int(np.prod(x.shape[1:]))

    # Lane-dense (B, M, 128) view, padded so M is a multiple of TM (and of 8).
    m_raw = -(-flat // 128)
    tm = min(int(tm_target), ((m_raw + 7) // 8) * 8)   # TM=1024 -> 512 KiB/array/block
    num_m = -(-m_raw // tm)
    m_pad = num_m * tm
    flat_pad = m_pad * 128

    x3 = _to_lane_view(x, B, flat, flat_pad, m_pad)
    n3 = _to_lane_view(noise, B, flat, flat_pad, m_pad)

    vol_spec = pl.BlockSpec((None, tm, 128), lambda b, m: (b, m, 0))
    smem_spec = pl.BlockSpec(memory_space=pltpu.MemorySpace.SMEM)
    itemsize = np.dtype(x.dtype).itemsize
    elems = B * flat_pad

    xt3 = pl.pallas_call(
        _q_sample_kernel,
        grid=(B, num_m),
        in_specs=[smem_spec, smem_spec, vol_spec, vol_spec],
        out_specs=vol_spec,
        out_shape=jax.ShapeDtypeStruct((B, m_pad, 128), x.dtype),
        compiler_params=pltpu.CompilerParams(
            dimension_semantics=("parallel", "parallel")),
        cost_estimate=pl.CostEstimate(
            flops=3 * elems,
            transcendentals=0,
            bytes_accessed=3 * elems * itemsize),
    )(coef_a, coef_s, x3, n3)

    return xt3.reshape(B, flat_pad)[:, :flat].reshape(orig_shape)


# ----------------------------------------------------------------------------
# MSSegDiff forward (q_sample branch)
# ----------------------------------------------------------------------------
class MSSegDiffPallas:
    def __init__(self, number_targets=2, num_timesteps=1000):
        self.number_targets = number_targets
        self.num_timesteps = num_timesteps
        self.sqrt_ac, self.sqrt_1m_ac = make_diffusion_schedule(num_timesteps)

    def _uniform_sampler(self, key, batch):
        # UniformSampler(1000): uniform timesteps, importance weights all 1.
        t = jax.random.randint(key, (batch,), 0, self.num_timesteps, dtype=jnp.int32)
        weight = jnp.ones((batch,), dtype=jnp.float32)
        return t, weight

    def forward(self, key, image=None, x=None, pred_type=None, step=None):
        if pred_type == "q_sample":
            key_noise, key_t = jax.random.split(key)
            t, _weight = self._uniform_sampler(key_t, x.shape[0])
            coef_a = self.sqrt_ac[t].astype(jnp.float32)      # (B,)
            coef_s = self.sqrt_1m_ac[t].astype(jnp.float32)   # (B,)
            noise = jax.random.normal(key_noise, x.shape, dtype=x.dtype)
            x_t = q_sample_pallas(x, noise, coef_a, coef_s)
            return x_t, t, noise
        elif pred_type in ("denoise", "ddim_sample"):
            # TODO(synk): requires full BasicUNetEncoder / BasicUNetDe 3D U-Nets
            # and the DDIM sampling loop; no compact Pallas equivalent here.
            raise NotImplementedError(pred_type)
        else:
            raise ValueError(f"unknown pred_type: {pred_type}")


if __name__ == "__main__":
    key = jax.random.PRNGKey(0)
    k_x, k_fwd, k_x2, k_fwd2 = jax.random.split(key, 4)

    model = MSSegDiffPallas(number_targets=2, num_timesteps=1000)

    # Case 1: lane-aligned target volume (B, number_targets, D, H, W).
    B, C, D, H, W = 2, 2, 8, 16, 16
    x = jax.random.normal(k_x, (B, C, D, H, W), dtype=jnp.float32)
    x_t, t, noise = model.forward(k_fwd, x=x, pred_type="q_sample")
    jax.block_until_ready(x_t)

    assert x_t.shape == x.shape and noise.shape == x.shape and t.shape == (B,)
    ca = model.sqrt_ac[t][:, None, None, None, None]
    cs = model.sqrt_1m_ac[t][:, None, None, None, None]
    ref = ca * x + cs * noise
    assert jnp.allclose(x_t, ref, atol=1e-5, rtol=1e-5), "x_t mismatch vs reference"

    # Noise sanity check (mean ~ 0, std ~ 1 over ~8k samples).
    nm = float(jnp.mean(noise))
    ns = float(jnp.std(noise))
    assert abs(nm) < 0.2 and 0.7 < ns < 1.3, (nm, ns)

    # Case 2: volume whose flattened size is NOT a multiple of 128
    # (exercises the padded / remainder path).
    x2 = jax.random.normal(k_x2, (2, 2, 7, 12, 12), dtype=jnp.float32)
    x2_t, t2, noise2 = model.forward(k_fwd2, x=x2, pred_type="q_sample")
    jax.block_until_ready(x2_t)
    ref2 = (model.sqrt_ac[t2][:, None, None, None, None] * x2
            + model.sqrt_1m_ac[t2][:, None, None, None, None] * noise2)
    assert x2_t.shape == x2.shape and noise2.shape == x2.shape
    assert jnp.allclose(x2_t, ref2, atol=1e-5, rtol=1e-5), "padded-path mismatch"

    print("KERNEL_OK")
</pallas_src>

<mosaic_0001>
module attributes {stable_mosaic.version = 11 : i64} {
  func.func @_q_sample_kernel(%arg0: i32, %arg1: i32, %arg2: memref<2xf32, #tpu.memory_space<smem>>, %arg3: memref<2xf32, #tpu.memory_space<smem>>, %arg4: memref<1x32x128xf32, #tpu.memory_space<vmem>>, %arg5: memref<1x32x128xf32, #tpu.memory_space<vmem>>, %arg6: memref<1x32x128xf32, #tpu.memory_space<vmem>>) attributes {dimension_semantics = [#tpu.dimension_semantics<parallel>, #tpu.dimension_semantics<parallel>], iteration_bounds = array<i64: 2, 1>, scalar_prefetch = 0 : i64, scratch_operands = 0 : i64, tpu.core_type = #tpu.core_type<tc>, window_params = [{transform_indices = @transform_0, window_bounds = array<i64: 2>}, {transform_indices = @transform_1, window_bounds = array<i64: 2>}, {transform_indices = @transform_2, window_bounds = array<i64: 1, 32, 128>}, {transform_indices = @transform_3, window_bounds = array<i64: 1, 32, 128>}, {transform_indices = @transform_4, window_bounds = array<i64: 1, 32, 128>}]} {
    %0 = arith.index_cast %arg0 : i32 to index
    %1 = memref.load %arg2[%0] : memref<2xf32, #tpu.memory_space<smem>>
    %2 = arith.index_cast %arg0 : i32 to index
    %3 = memref.load %arg3[%2] : memref<2xf32, #tpu.memory_space<smem>>
    %c0 = arith.constant 0 : index
    %c0_0 = arith.constant 0 : index
    %c0_1 = arith.constant 0 : index
    %4 = vector.load %arg4[%c0, %c0_0, %c0_1] : memref<1x32x128xf32, #tpu.memory_space<vmem>>, vector<1x32x128xf32>
    %5 = vector.shape_cast %4 : vector<1x32x128xf32> to vector<32x128xf32>
    %6 = vector.broadcast %1 : f32 to vector<32x128xf32>
    %7 = arith.mulf %6, %5 : vector<32x128xf32>
    %c0_2 = arith.constant 0 : index
    %c0_3 = arith.constant 0 : index
    %c0_4 = arith.constant 0 : index
    %8 = vector.load %arg5[%c0_2, %c0_3, %c0_4] : memref<1x32x128xf32, #tpu.memory_space<vmem>>, vector<1x32x128xf32>
    %9 = vector.shape_cast %8 : vector<1x32x128xf32> to vector<32x128xf32>
    %10 = vector.broadcast %3 : f32 to vector<32x128xf32>
    %11 = arith.mulf %10, %9 : vector<32x128xf32>
    %12 = arith.addf %7, %11 : vector<32x128xf32>
    %c0_5 = arith.constant 0 : index
    %c0_6 = arith.constant 0 : index
    %c0_7 = arith.constant 0 : index
    %13 = vector.load %arg6[%c0_5, %c0_6, %c0_7] : memref<1x32x128xf32, #tpu.memory_space<vmem>>, vector<1x32x128xf32>
    %14 = vector.shape_cast %13 : vector<1x32x128xf32> to vector<32x128xf32>
    %15 = vector.shape_cast %12 : vector<32x128xf32> to vector<1x32x128xf32>
    tpu.vector_store %arg6[%c0_5, %c0_6, %c0_7], %15 {strides = array<i32>} : memref<1x32x128xf32, #tpu.memory_space<vmem>>, vector<1x32x128xf32>,
    return
  }
  func.func @transform_0(%arg0: i32, %arg1: i32) -> i32 {
    %c0_i32 = arith.constant 0 : i32
    %c0_i32_0 = arith.constant 0 : i32
    return %c0_i32 : i32
  }
  func.func @transform_1(%arg0: i32, %arg1: i32) -> i32 {
    %c0_i32 = arith.constant 0 : i32
    %c0_i32_0 = arith.constant 0 : i32
    return %c0_i32 : i32
  }
  func.func @transform_2(%arg0: i32, %arg1: i32) -> (i32, i32, i32) {
    %c0_i32 = arith.constant 0 : i32
    %c0_i32_0 = arith.constant 0 : i32
    return %arg0, %arg1, %c0_i32 : i32, i32, i32
  }
  func.func @transform_3(%arg0: i32, %arg1: i32) -> (i32, i32, i32) {
    %c0_i32 = arith.constant 0 : i32
    %c0_i32_0 = arith.constant 0 : i32
    return %arg0, %arg1, %c0_i32 : i32, i32, i32
  }
  func.func @transform_4(%arg0: i32, %arg1: i32) -> (i32, i32, i32) {
    %c0_i32 = arith.constant 0 : i32
    %c0_i32_0 = arith.constant 0 : i32
    return %arg0, %arg1, %c0_i32 : i32, i32, i32
  }
}

</mosaic_0001>

<bundles_post_ra>
// kernel: tpu_custom_call.1
= control target key start
LH: loop header
LB: loop body
LE: loop exit
PB: predicated region body
PF: predicated region fallthrough
CT: control target
= control target key end

     0   :  { %s1098_s0 = inlined_call_operand.hbm [shape: f32[2], index: 0, kind: input, shape index: {}]   ;;  %s1099_s1 = inlined_call_operand.vmem [shape: f32[2], index: 1, kind: input, shape index: {}]   ;;  %s1100_s2 = inlined_call_operand.hbm [shape: f32[2,32,128], index: 2, kind: input, shape index: {}]   ;;  %s1101_s3 = inlined_call_operand.hbm [shape: f32[2,32,128], index: 3, kind: input, shape index: {}]   ;;  %s1102_s4 = inlined_call_operand.hbm [shape: f32[2,32,128], index: 4, kind: output, shape index: {}]  }
   0x1   :  { %1108 = sst [smem:[#allocation17_spill]] %s1098_s0 }
   0x2   :  { %1109 = sst [smem:[#allocation18_spill]] %s1099_s1 }
   0x3   :  { %1110 = sst [smem:[#allocation19_spill]] %s1100_s2 }
   0x4   :  { %9 = vsyncpa [#allocation5], 0 }
   0x5   :  { %10 = vsyncpa [#allocation6], 0 }
   0x6   :  { %11 = vsyncpa [#allocation3], 0 }
   0x7   :  { %13 = vsyncpa [#allocation3 + $0x1], 0 }
   0x8   :  { %14 = vsyncpa [#allocation10], 0 }
   0x9   :  { %16 = vsyncpa [#allocation10 + $0x1], 0 }
   0xa   :  { %17 = vsyncpa [#allocation4], 0 }
   0xb   :  { %19 = vsyncpa [#allocation4 + $0x1], 0  ;;  %s823_s15 = smov 0   ;;  %s825_s16 = smov 0  }
   0xc   :  { %s827_s17 = smov 0   ;;  %s829_s18 = smov 0  }
   0xd   :  { %s831_s19 = smov 0   ;;  %s833_s20 = smov 0  }
   0xe LB: > { %s487_s21 = sadd.s32 4294967295, %s787_s20   ;;  %s488_s22 = sadd.s32 4294967294, %s787_s20   ;;  %s787_s20 = sphi %s833_s20, %s25_s20   ;;  %s783_s19 = sphi %s831_s19, %s1131_s19   ;;  %s779_s18 = sphi %s829_s18, %s1130_s18   ;;  %s775_s17 = sphi %s827_s17, %s1129_s17   ;;  %s771_s16 = sphi %s825_s16, %s1128_s16   ;;  %s767_s15 = sphi %s823_s15, %s1127_s15  }
   0xf   : > { %s88_s23 = sadd.s32 1, %s775_s17  ;;  %p95_p0 = scmp.ne.s32.totalorder %s775_s17, %s771_s16 }
  0x10   : > { %p96_p1 = scmp.eq.s32.totalorder %s787_s20, 0  ;;  %p101_p2 = scmp.ne.s32.totalorder %s771_s16, %s767_s15 }
  0x11   : > { %p861_p3 = scmp.eq.s32.totalorder %s487_s21, 0  ;;  %p155_p4 = scmp.eq.s32.totalorder %s487_s21, 1 }
  0x12   : > { %p97_p5 = por %p96_p1, %p95_p0  ;;  %p161_p6 = scmp.eq.s32.totalorder %s488_s22, 1 }
  0x13   : > { %s1111_s24 = scalar_select %p861_p3, 1, 0 }
  0x14   : > { %p867_p7 = por %p861_p3, %p101_p2  ;;  %p871_p8 = por %p155_p4, %p95_p0 }
  0x15   : > { %p875_p9 = por %p161_p6, %p101_p2  ;;  %p489_p10 = scmp.ge.s32.totalorder %s787_s20, 1 }
  0x16   : > { %s1112_s25 = scalar_select %p867_p7, 1, 0 }
  0x17   : > { %s1113_s26 = scalar_select %p871_p8, 1, 0 }
  0x18   : > { %s1114_s27 = scalar_select %p875_p9, 1, 0 }
  0x19   : > { %p168_p11 = scmp.lt.s32.totalorder %s787_s20, 3  ;;  %p547_p1 = scmp.lt.s32.totalorder %s787_s20, 2 }
  0x1a   : > { %s1116_s1 = sld [smem:[#allocation18_spill]]  ;;  %s903_s8 = sand.u32 1, %s775_s17  }
  0x1b   : > { %p882_p13 = pnand %p489_p10, %p168_p11  ;;  %p892_p4 = pnand %p547_p1, %p97_p5 }
  0x1c   : > { %s37_s9 = sadd.s32 1, %s783_s19  ;;  %s1119_s0 = sld [smem:[#allocation17_spill]] }
  0x1d   : > { %p527_p0 = pneg %p882_p13 }
  0x1f   : > { %p898_p2 = pnand %p527_p0, %p861_p3 }
  0x20   : > { %s190_s5 = sshll.u32 %s1116_s1, 4  ;;  %s191_s5 = int_to_ptr.vmem [resolvable:$true] %s190_s5 }
  0x21   : > { %p607_p6 = pneg %p898_p2 }
  0x22   : > { %s605_s12 = scalar_lea.hbm %s1119_s0, 16 }
  0x23   : > { %p606_p5 = scmp.ne.s32.totalorder %s1119_s0, %s605_s12  ;;  %p612_p1 = scmp.lt.u32.totalorder %s605_s12, %s1119_s0 }
  0x25   : > { %p608_p10 = pnand %p607_p6, %p606_p5 }
  0x27   : > { %p609_p11 = pneg %p608_p10 }
  0x29   : > { %p614_p0 = pnand %p612_p1, %p609_p11 }
  0x2b   : > { %617 = shalt.err (!%p614_p0)
}
  0x2c   : > { %s789_s29 = smov [#allocation2]   ;;  %s618_s11 = scalar_lea.vmem %s191_s5, 16 }
  0x2d   : > { %530 = dma.hbm_to_smem (!%p898_p2), %s1119_s0, 16, %s789_s29, [#allocation5]  }
  0x2e   : > { %p619_p12 = scmp.ne.s32.totalorder %s191_s5, %s618_s11  ;;  %p626_p7 = scmp.lt.s32.totalorder %s191_s5, %s191_s5 }
  0x2f   : > { %p627_p5 = scmp.lt.s32.totalorder %s618_s11, %s618_s11 }
  0x30   : > { %p621_p9 = pnand %p619_p12, %p607_p6 }
  0x31   : > { %p628_p10 = por %p627_p5, %p626_p7 }
  0x32   : > { %p622_p8 = pneg %p621_p9 }
  0x34   : > { %p629_p3 = pnand %p628_p10, %p622_p8 }
  0x36   : > { %632 = shalt.err (!%p629_p3)
}
  0x37   : > { %s790_s13 = smov [#allocation7]   ;;  %p39_p9 = scmp.ge.s32.totalorder %s37_s9, 2 }
  0x38   : > { %533 = dma.vmem_to_smem (!%p898_p2), %s191_s5, 16, %s790_s13, [#allocation6]  }
  0x39   : > { %s1107_s12 = sshll.u32 %s903_s8, 5  ;;  %s510_s14 = sshll.u32 %s783_s19, 9 }
  0x3a   : > { %s1133_s9 = smov (%p39_p9, %s37_s9), 0  ;;  %s1120_s2 = sld [smem:[#allocation19_spill]] }
  0x3b   : > { %s83_s29 = ssub.s32 %s783_s19, %s1133_s9  ;;  %s205_s5 = scalar_lea.vmem [#allocation8], %s1107_s12 }
  0x3c   : > { %s214_s30 = sshll.u32 %s205_s5, 4  ;;  %p86_p3 = scmp.eq.s32.totalorder %s83_s29, 0  ;;  %s939_s30 = int_to_ptr.vmem [resolvable:$true] %s214_s30 }
  0x3d   : > { %s202_s11 = scalar_lea.sflag [#allocation3], %s903_s8  ;;  %p635_p8 = pneg %p892_p4 }
  0x3e   : > { %s944_s10 = scalar_select %p86_p3, %s775_s17, %s88_s23  }
  0x40   : > { %s933_s7 = scalar_lea.hbm %s1120_s2, %s510_s14  ;;  %s638_s12 = scalar_lea.hbm %s1120_s2, 1024 }
  0x41   : > { %s633_s13 = scalar_lea.hbm %s933_s7, 512  ;;  %p639_p6 = scmp.lt.u32.totalorder %s933_s7, %s1120_s2 }
  0x42   : > { %p634_p7 = scmp.ne.s32.totalorder %s933_s7, %s633_s13  ;;  %p640_p11 = scmp.lt.u32.totalorder %s638_s12, %s633_s13 }
  0x43   : > { %p642_p0 = scmp.lt.u32.totalorder %s633_s13, %s933_s7 }
  0x44   : > { %p636_p12 = pnand %p635_p8, %p634_p7  ;;  %p641_p1 = por %p640_p11, %p639_p6 }
  0x46   : > { %p637_p2 = pneg %p636_p12  ;;  %p643_p5 = por %p642_p0, %p641_p1 }
  0x48   : > { %p644_p10 = pnand %p643_p5, %p637_p2 }
  0x4a   : > { %647 = shalt.err (!%p644_p10)
}
  0x4b   : > { %s648_s23 = scalar_lea.vmem %s939_s30, 512  ;;  %s791_s21 = smov [#allocation8]  }
  0x4c   : > { %p649_p9 = scmp.ne.s32.totalorder %s939_s30, %s648_s23  ;;  %s653_s22 = sshll.u32 %s791_s21, 4  ;;  %s654_s22 = int_to_ptr.vmem [resolvable:$false] %s653_s22 }
  0x4d   : > { %s655_s5 = scalar_lea.vmem %s654_s22, 1024  ;;  %p656_p12 = scmp.lt.s32.totalorder %s939_s30, %s654_s22 }
  0x4e   : > { %p651_p3 = pnand %p649_p9, %p635_p8  ;;  %p657_p6 = scmp.lt.s32.totalorder %s655_s5, %s648_s23 }
  0x50   : > { %p652_p7 = pneg %p651_p3  ;;  %p658_p11 = por %p657_p6, %p656_p12 }
  0x52   : > { %p659_p1 = pnand %p658_p11, %p652_p7 }
  0x54   : > { %662 = shalt.err (!%p659_p1)
}
  0x55   : > { %s792_s12 = smov 128   ;;  %s793_s13 = smov 8  }
  0x56   : > { %537 = dma.hbm_to_vmem [thread:$0]  (!%p892_p4), %s933_s7, 512, %s939_s30, %s202_s11, %s792_s12, %s792_s12, %s793_s13  }
  0x57   : > { %s982_s21 = scalar_lea.hbm %s1101_s3, %s510_s14  ;;  %s1121_s22 = sshll.u32 %s903_s8, 5 }
  0x58   : > { %s228_s5 = scalar_lea.vmem [#allocation9], %s1121_s22  ;;  %s225_s1 = scalar_lea.sflag [#allocation10], %s903_s8 }
  0x59   : > { %s237_s0 = sshll.u32 %s228_s5, 4  ;;  %s663_s2 = scalar_lea.hbm %s982_s21, 512  ;;  %s986_s0 = int_to_ptr.vmem [resolvable:$true] %s237_s0 }
  0x5a   : > { %p664_p2 = scmp.ne.s32.totalorder %s982_s21, %s663_s2  ;;  %s668_s14 = scalar_lea.hbm %s1101_s3, 1024 }
  0x5b   : > { %p669_p10 = scmp.lt.u32.totalorder %s982_s21, %s1101_s3  ;;  %p670_p9 = scmp.lt.u32.totalorder %s668_s14, %s663_s2 }
  0x5c   : > { %p666_p0 = pnand %p664_p2, %p635_p8  ;;  %p672_p7 = scmp.lt.u32.totalorder %s663_s2, %s982_s21 }
  0x5d   : > { %p671_p3 = por %p670_p9, %p669_p10 }
  0x5e   : > { %p667_p5 = pneg %p666_p0 }
  0x5f   : > { %p673_p12 = por %p672_p7, %p671_p3 }
  0x61   : > { %p674_p6 = pnand %p673_p12, %p667_p5 }
  0x63   : > { %677 = shalt.err (!%p674_p6)
}
  0x64   : > { %s678_s23 = scalar_lea.vmem %s986_s0, 512  ;;  %s794_s22 = smov [#allocation9]  }
  0x65   : > { %p679_p11 = scmp.ne.s32.totalorder %s986_s0, %s678_s23  ;;  %s683_s5 = sshll.u32 %s794_s22, 4  ;;  %s684_s5 = int_to_ptr.vmem [resolvable:$false] %s683_s5 }
  0x66   : > { %s685_s7 = scalar_lea.vmem %s684_s5, 1024  ;;  %p686_p0 = scmp.lt.s32.totalorder %s986_s0, %s684_s5 }
  0x67   : > { %p681_p1 = pnand %p679_p11, %p635_p8  ;;  %p687_p10 = scmp.lt.s32.totalorder %s685_s7, %s678_s23 }
  0x69   : > { %p682_p2 = pneg %p681_p1  ;;  %p688_p9 = por %p687_p10, %p686_p0 }
  0x6b   : > { %p689_p3 = pnand %p688_p9, %p682_p2 }
  0x6d   : > { %692 = shalt.err (!%p689_p3)
}
  0x6e   : > { %540 = dma.hbm_to_vmem [thread:$0]  (!%p892_p4), %s982_s21, 512, %s986_s0, %s225_s1, %s792_s12, %s792_s12, %s793_s13  }
  0x6f   : > { %249 = sbr.rel (%p882_p13) target bundleno = 157 (0x9d), region = 36  ;;  %p1122_p8 = scmp.ne.s32.totalorder (!%p882_p13), %s1111_s24, 0 }
  0x76   : > { %746 = dma.done.wait (%p1122_p8), [#allocation5], 16  }
  0x77   : > { %748 = vsyncadd (%p1122_p8), [#allocation5], 4294967280 }
  0x78   : > { %750 = dma.done.wait (%p1122_p8), [#allocation6], 16  }
  0x79   : > { %752 = vsyncadd (%p1122_p8), [#allocation6], 4294967280  ;;  %s1028_s2 = sand.u32 1, %s771_s16   ;;  %p1123_p13 = scmp.ne.s32.totalorder %s1112_s25, 0 }
  0x7a   : > { %s502_s0 = sshll.u32 %s1028_s2, 5  ;;  %s260_s1 = scalar_lea.sflag [#allocation3], %s1028_s2 }
  0x7b   : > { %s263_s28 = scalar_lea.vmem [#allocation8], %s502_s0 }
  0x7c   : > { %754 = dma.done.wait (%p1123_p13), %s260_s1, 512  }
  0x7d   : > { %756 = vsyncadd (%p1123_p13), %s260_s1, 4294966784  ;;  %s269_s6 = scalar_lea.sflag [#allocation10], %s1028_s2  ;;  %s272_s8 = scalar_lea.vmem [#allocation9], %s502_s0 }
  0x7e   : > { %758 = dma.done.wait (%p1123_p13), %s269_s6, 512  }
  0x7f   : > { %760 = vsyncadd (%p1123_p13), %s269_s6, 4294966784 }
  0x80   : > { %277 = sfence }
  0x81   : > { %s306_s24 = sld [smem:[#allocation2 + %s779_s18]]  ;;  %v308_v0 = vld [vmem:[%s263_s28] sm:$0xff]  ;;  %v309_v2 = vld [vmem:[%s263_s28 + $0x8] sm:$0xff]  ;;  %v310_v3 = vld [vmem:[%s263_s28 + $0x10] sm:$0xff]  ;;  %s302_s13 = scalar_lea.vmem [#allocation11], %s502_s0 }
  0x82   : > { %s307_s12 = sld [smem:[#allocation7 + %s779_s18]]  ;;  %v317_v1 = vld [vmem:[%s272_s8] sm:$0xff]  ;;  %v318_v4 = vld [vmem:[%s272_s8 + $0x8] sm:$0xff]  ;;  %v319_v5 = vld [vmem:[%s272_s8 + $0x10] sm:$0xff]  ;;  %s350_s21 = sshll.u32 %s302_s13, 4  ;;  %s1044_s21 = int_to_ptr.vmem [resolvable:$true] %s350_s21 }
  0x83   : > { %v311_v6 = vld [vmem:[%s263_s28 + $0x18] sm:$0xff]  ;;  %s512_s25 = sshll.u32 %s779_s18, 9  ;;  %s335_s18 = scalar_lea.sflag [#allocation4], %s1028_s2 }
  0x84   : > { %v320_v8 = vld [vmem:[%s272_s8 + $0x18] sm:$0xff]  ;;  %s1049_s11 = scalar_lea.hbm %s1102_s4, %s512_s25  ;;  %s693_s29 = scalar_lea.vmem %s1044_s21, 512 }
  0x85   : > { %p694_p4 = scmp.ne.s32.totalorder %s1044_s21, %s693_s29  ;;  %p1124_p5 = scmp.ne.s32.totalorder %s1113_s26, 0 }
  0x86   : > { %s795_s23 = smov [#allocation11]  }
  0x87   : > { %v312_v7 = vstv %s306_s24  ;;  %p695_p7 = pnand %p694_p4, %p1124_p5  ;;  %s697_s22 = sshll.u32 %s795_s23, 4  ;;  %s698_s22 = int_to_ptr.vmem [resolvable:$false] %s697_s22 }
  0x88   : > { %v313_v9 = vmul.f32 %v312_v7, %v308_v0  ;;  %v321_v10 = vstv %s307_s12  ;;  %v314_v11 = vmul.f32 %v312_v7, %v309_v2  ;;  %v315_v12 = vmul.f32 %v312_v7, %v310_v3  ;;  %s699_s5 = scalar_lea.vmem %s698_s22, 1024  ;;  %p700_p6 = scmp.lt.s32.totalorder %s1044_s21, %s698_s22 }
  0x89   : > { %v322_v13 = vmul.f32 %v321_v10, %v317_v1  ;;  %v323_v14 = vmul.f32 %v321_v10, %v318_v4  ;;  %v324_v15 = vmul.f32 %v321_v10, %v319_v5  ;;  %v316_v16 = vmul.f32 %v312_v7, %v311_v6  ;;  %p696_p12 = pneg %p695_p7  ;;  %p701_p11 = scmp.lt.s32.totalorder %s699_s5, %s693_s29 }
  0x8a   : > { %v325_v17 = vmul.f32 %v321_v10, %v320_v8 }
  0x8b   : > { %v326_v18 = vadd.f32 %v322_v13, %v313_v9  ;;  %v327_v19 = vadd.f32 %v323_v14, %v314_v11  ;;  %v328_v20 = vadd.f32 %v324_v15, %v315_v12  ;;  %p702_p1 = por %p701_p11, %p700_p6 }
  0x8c   : > { %v329_v21 = vadd.f32 %v325_v17, %v316_v16 }
  0x8d   : > { %330 = vst [vmem:[%s302_s13] sm:$0xff] %v326_v18  ;;  %331 = vst [vmem:[%s302_s13 + $0x8] sm:$0xff] %v327_v19  ;;  %p703_p2 = pnand %p702_p1, %p696_p12 }
  0x8e   : > { %332 = vst [vmem:[%s302_s13 + $0x10] sm:$0xff] %v328_v20  ;;  %333 = vst [vmem:[%s302_s13 + $0x18] sm:$0xff] %v329_v21 }
  0x8f   : > { %706 = shalt.err (!%p703_p2)
}
  0x90   : > { %s707_s7 = scalar_lea.hbm %s1049_s11, 512  ;;  %s711_s28 = scalar_lea.hbm %s1102_s4, 1024 }
  0x91   : > { %p708_p0 = scmp.ne.s32.totalorder %s1049_s11, %s707_s7  ;;  %p712_p3 = scmp.lt.u32.totalorder %s1049_s11, %s1102_s4 }
  0x92   : > { %p713_p8 = scmp.lt.u32.totalorder %s711_s28, %s707_s7  ;;  %p715_p4 = scmp.lt.u32.totalorder %s707_s7, %s1049_s11 }
  0x93   : > { %p709_p10 = pnand %p708_p0, %p1124_p5 }
  0x94   : > { %p714_p13 = por %p713_p8, %p712_p3 }
  0x95   : > { %p710_p9 = pneg %p709_p10 }
  0x96   : > { %p716_p7 = por %p715_p4, %p714_p13 }
  0x98   : > { %p717_p12 = pnand %p716_p7, %p710_p9 }
  0x9a   : > { %720 = shalt.err (!%p717_p12)
}
  0x9b   : > { %s796_s24 = smov 128   ;;  %s797_s12 = smov 8  }
  0x9c   : > { %525 = dma.vmem_to_hbm [thread:$0]  (%p1124_p5), %s1044_s21, 512, %s1049_s11, %s335_s18, %s796_s24, %s796_s24, %s797_s12  }
  0x9d PF: > { %s365_s13 = sand.u32 1, %s767_s15   ;;  %p1125_p6 = scmp.ne.s32.totalorder %s1114_s27, 0 }
  0x9e   : > { %p1126_p11 = scmp.ge.s32.totalorder %s787_s20, 2  ;;  %s366_s25 = scalar_lea.sflag [#allocation4], %s365_s13 }
  0xa0   : > { %p542_p1 = pnand %p1126_p11, %p1125_p6 }
  0xa2   : > { %762 = dma.done.wait (!%p542_p1), %s366_s25, 512  }
  0xa3   : > { %764 = vsyncadd (!%p542_p1), %s366_s25, 4294966784  ;;  %s25_s20 = sadd.s32 1, %s787_s20   ;;  %s1127_s15 = smov %s771_s16 }
  0xa4   : > { %p22_p2 = scmp.ge.s32.totalorder %s25_s20, 4   ;;  %s1128_s16 = smov %s775_s17 }
  0xa5   : > { %s1129_s17 = smov %s944_s10  ;;  %s1130_s18 = smov %s783_s19 }
  0xa6   : > { %s1131_s19 = smov %s1133_s9  ;;  %24 = sbr.rel (!%p22_p2) target bundleno = 14 (0xe), region = 104 }
  0xad   :  { %371 = vsyncpa [#allocation3], 1 }
  0xae   :  { %373 = vsyncpa [#allocation3 + $0x1], 1 }
  0xaf   :  { %374 = vsyncpa [#allocation10], 1 }
  0xb0   :  { %376 = vsyncpa [#allocation10 + $0x1], 1 }
  0xb1   :  { %377 = vsyncpa [#allocation4], 1 }
  0xb2   :  { %379 = vsyncpa [#allocation4 + $0x1], 1 }
  0xb3   :  { %380 = vsyncpa [#allocation5], 1 }
  0xb4   :  { %382 = vsyncpa [#allocation5 + $0x1], 1 }
  0xb5   :  { %383 = vsyncpa [#allocation6], 1 }
  0xb6   :  { %385 = vsyncpa [#allocation6 + $0x1], 1 }

</bundles_post_ra>
